<compile_context>
chip_gen: v5e
topology: v5e:2x2
jax: 0.10.0
libtpu: 0.0.40
codegen_flags: <defaults>
</compile_context>

<pallas_src>
import functools

import jax
import jax.numpy as jnp
import numpy as np
from jax.experimental import pallas as pl
from jax.experimental.pallas import tpu as pltpu


# ---------------------------------------------------------------------------
# Static parameter construction (mirrors SpikeEncoder.__init__)
# ---------------------------------------------------------------------------
def gaussian_taps(kernel_size: int):
    pad = kernel_size // 2
    coords = np.arange(kernel_size) - pad
    sigma = kernel_size / 6.0
    g = np.exp(-(coords ** 2) / (2.0 * sigma ** 2))
    g = g / g.sum()
    return tuple(float(v) for v in g)


def gaussian_conv_matrix(num_bins: int, kernel_size: int) -> jnp.ndarray:
    """Banded (T, T) matrix == depthwise 'same' Gaussian Conv1d (reference only)."""
    pad = kernel_size // 2
    g = gaussian_taps(kernel_size)
    mat = np.zeros((num_bins, num_bins), dtype=np.float32)
    for t in range(num_bins):
        for k in range(kernel_size):
            j = t + k - pad
            if 0 <= j < num_bins:
                mat[t, j] += g[k]
    return jnp.asarray(mat)


def _round_up(x: int, m: int) -> int:
    return ((x + m - 1) // m) * m


def _chip_config():
    """Per-generation dtype / VMEM-budget choices (safe bf16 fallback)."""
    try:
        kind = jax.devices()[0].device_kind.lower()
    except Exception:  # pragma: no cover - defensive
        kind = ""
    fp8 = getattr(jnp, "float8_e4m3fn", None)
    if "v7" in kind and fp8 is not None:
        # v7x: fp8 MXU (no int path), 64 MiB VMEM per TensorCore.
        return dict(oh_dtype=fp8, acc_dtype=jnp.float32,
                    vmem_budget=40 << 20, vmem_cap=56 << 20, nt_cap=4096)
    if "v5" in kind or "v6" in kind:
        # v5e/v6e: int8 MXU path, 128 MiB VMEM.
        return dict(oh_dtype=jnp.int8, acc_dtype=jnp.int32,
                    vmem_budget=64 << 20, vmem_cap=96 << 20, nt_cap=8192)
    # Unknown chip: conservative, bf16 MXU, leave the scoped-VMEM default.
    return dict(oh_dtype=jnp.bfloat16, acc_dtype=jnp.float32,
                vmem_budget=10 << 20, vmem_cap=None, nt_cap=2048)


# ---------------------------------------------------------------------------
# Index preparation glue (exact bucketize; shared with the reference)
# ---------------------------------------------------------------------------
def _prep_indices(events, *, num_bins, height, width):
    """events: (B, N, 4) float32 with columns (x, y, t, polarity)."""
    xs = jnp.clip(events[:, :, 0].astype(jnp.int32), 0, height - 1)
    ys = jnp.clip(events[:, :, 1].astype(jnp.int32), 0, width - 1)
    ts = jnp.clip(events[:, :, 2], 0.0, 1.0)
    # torch.bucketize(ts, linspace(0,1,T+1)[1:-1], right=True) == number of
    # interior edges <= ts.  Loop over the (few) edges so no (B, N, T-1)
    # tensor is materialized and the exact edge comparisons match PyTorch
    # (no floor(ts*T) rounding skew at bin boundaries).
    edges = np.linspace(0.0, 1.0, num_bins + 1, dtype=np.float32)[1:-1]
    bin_idx = jnp.zeros(ts.shape, dtype=jnp.int32)
    for e in edges:
        bin_idx = bin_idx + (ts >= jnp.float32(e)).astype(jnp.int32)
    pixel_idx = (xs * width + ys).astype(jnp.int32)
    return bin_idx, pixel_idx


# ---------------------------------------------------------------------------
# Pallas kernel
#   grid = (batch blocks, event tiles); the event-tile axis is the reduction.
# ---------------------------------------------------------------------------
def _spike_encoder_kernel(bin_ref, pix_ref, tgt_ref, out_ref, acc_ref, iota_ref,
                          *, num_bins, P, P_pad, BB, taps, eps,
                          oh_dtype, acc_dtype):
    T = num_bins
    KS = len(taps)
    k_step = pl.program_id(1)

    @pl.when(k_step == 0)
    def _init():
        acc_ref[...] = jnp.zeros_like(acc_ref)
        # Persistent pixel-id iota: regenerated once per batch block (not per
        # event tile), so steady-state VALU work is just the compares/casts.
        iota_ref[...] = jax.lax.broadcasted_iota(jnp.int32, iota_ref.shape, 0)

    def _accumulate(b):
        bins = bin_ref[b]                                   # (1, nt) int32
        pixs = pix_ref[b]                                   # (1, nt) int32
        tgt_col = tgt_ref[...]                              # (T+2*pad, 1) int32
        # Narrow one-hots (int8 on v5e/v6e -> exact int32 MXU accumulation,
        # fp8/bf16 -> exact f32 accumulation since values are only 0/1).
        oh_bin = (bins == tgt_col).astype(oh_dtype)         # (T+2*pad, nt)
        oh_pix = (pixs == iota_ref[...]).astype(oh_dtype)   # (P_pad,    nt)
        # One MXU matmul per (batch element, event tile): contract the event
        # axis (q @ k^T form).  Counts are exact integers.
        prod = jax.lax.dot_general(oh_bin, oh_pix, (((1,), (1,)), ((), ())),
                                   preferred_element_type=acc_dtype)
        acc_ref[b] = acc_ref[b] + prod.astype(jnp.float32)

    if BB == 1:
        _accumulate(0)
    else:
        # fori_loop (not a static unroll) bounds the live range of the
        # multi-MiB one-hot temporaries to a single batch element.
        def _loop_body(b, carry):
            _accumulate(b)
            return carry
        jax.lax.fori_loop(0, BB, _loop_body, 0)

    @pl.when(k_step == pl.num_programs(1) - 1)
    def _finalize():
        inv_p = 1.0 / float(P)
        inv_tp = 1.0 / float(T * P)
        if P_pad != P:
            col = jax.lax.broadcasted_iota(jnp.int32, (T, P_pad), 1)
            valid = col < P
        for b in range(BB):                 # tiny epilogue; keep unrolled
            stacked = acc_ref[b]            # (T + 2*pad, P_pad) exact hist f32
            # 'same' Gaussian conv over time: acc row j already holds the
            # histogram for bin (j - pad), boundary rows are all-zero, so the
            # smoothing is KS tap-weighted static slices (pure VPU, f32).
            sm = taps[0] * stacked[0:T, :]
            for kk in range(1, KS):
                sm = sm + taps[kk] * stacked[kk:kk + T, :]
            # pixel LayerNorm over P (two-pass variance in f32).
            mean = jnp.sum(sm, axis=-1, keepdims=True) * inv_p
            diff = sm - mean
            if P_pad != P:
                diff = jnp.where(valid, diff, 0.0)
            var = jnp.sum(diff * diff, axis=-1, keepdims=True) * inv_p
            x = diff * jax.lax.rsqrt(var + eps)
            # global LayerNorm over (T, P) (two-pass variance in f32).
            gmean = jnp.sum(x, axis=(0, 1), keepdims=True) * inv_tp
            gdiff = x - gmean
            if P_pad != P:
                gdiff = jnp.where(valid, gdiff, 0.0)
            gvar = jnp.sum(gdiff * gdiff, axis=(0, 1), keepdims=True) * inv_tp
            out_ref[b] = gdiff * jax.lax.rsqrt(gvar + eps)
            # TODO(synk): trainable pixel_norm / global_norm affine params
            # (identity at init) are not plumbed through; apply them here when
            # loading a trained checkpoint.


# ---------------------------------------------------------------------------
# Wrapper
# ---------------------------------------------------------------------------
def spike_encoder_forward(events, *, num_bins, height, width,
                          smooth_kernel_size=5):
    """events: (B, N, 4) float32 with columns (x, y, t, polarity)."""
    B, N, _ = events.shape
    P = height * width
    T = num_bins
    KS = smooth_kernel_size
    pad = KS // 2
    T_acc = T + 2 * pad
    eps = 1e-5

    bin_idx, pixel_idx = _prep_indices(events, num_bins=T,
                                       height=height, width=width)

    cfg = _chip_config()
    oh_dtype, acc_dtype = cfg["oh_dtype"], cfg["acc_dtype"]
    oh_bytes = jnp.dtype(oh_dtype).itemsize

    # ---- tiling choices -------------------------------------------------
    ALIGN = 256                                   # MXU contraction alignment
    P_pad = _round_up(P, 128)                     # lane-dense output / acc
    # >=2 blocks on the parallel batch axis whenever B >= 2 (v7x: 2 TCs).
    BB = max(1, min(4, (B + 1) // 2)) if P_pad <= 1024 else 1
    b_pad = _round_up(B, BB)

    # Size the event tile against the per-chip VMEM budget.  Per event column
    # the transients are ~(int32 iota + compare-mask headroom + narrow
    # one-hot) on P_pad rows, plus the small bin one-hot chain and the
    # double-buffered index streams; fixed cost is acc + output buffers.
    per_col = P_pad * (8 + oh_bytes) + T_acc * (4 + oh_bytes) + 16 * BB
    fixed = BB * (T_acc + 2 * T) * P_pad * 4 + (1 << 20)
    nt = (cfg["vmem_budget"] - fixed) // per_col
    nt = max(ALIGN, (nt // ALIGN) * ALIGN)
    nt = min(nt, cfg["nt_cap"], _round_up(N, ALIGN))
    n_pad = _round_up(N, nt)

    # ---- lane-major (B, 1, N) int32 index streams, padded ----------------
    # Padded events carry an out-of-range bin sentinel so they never match any
    # accumulator row and contribute nothing to the histogram.
    sentinel = T + KS
    bin_p = jnp.full((b_pad, n_pad), sentinel, dtype=jnp.int32)
    bin_p = bin_p.at[:B, :N].set(bin_idx)
    pix_p = jnp.zeros((b_pad, n_pad), dtype=jnp.int32)
    pix_p = pix_p.at[:B, :N].set(pixel_idx)
    bin_in = bin_p.reshape(b_pad, 1, n_pad)
    pix_in = pix_p.reshape(b_pad, 1, n_pad)

    # Conv-shifted bin targets: accumulator row j collects events whose bin
    # index == j - pad (rows outside [pad, pad+T) stay zero == the conv's
    # zero padding).  The Gaussian taps themselves are applied at finalize.
    targets = jnp.asarray((np.arange(T_acc, dtype=np.int32) - pad)
                          .reshape(T_acc, 1))

    taps = gaussian_taps(KS)
    kernel = functools.partial(_spike_encoder_kernel, num_bins=T, P=P,
                               P_pad=P_pad, BB=BB, taps=taps, eps=eps,
                               oh_dtype=oh_dtype, acc_dtype=acc_dtype)
    grid = (b_pad // BB, n_pad // nt)

    # Accurate VMEM estimate (iota + mask + one-hots + acc + out + dbuf'ed
    # inputs) -> always set the scoped-VMEM limit on known chips.
    est = (P_pad * nt * (8 + oh_bytes)          # iota + mask headroom + one-hot
           + T_acc * nt * (4 + oh_bytes)        # bin compare chain
           + BB * (T_acc + 2 * T) * P_pad * 4   # accumulator + out buffers
           + 4 * BB * nt * 4                    # double-buffered index streams
           + 4096)
    cp = dict(dimension_semantics=("parallel", "arbitrary"))
    if cfg["vmem_cap"] is not None:
        cp["vmem_limit_bytes"] = int(min(max(est + (8 << 20), 32 << 20),
                                         cfg["vmem_cap"]))

    out = pl.pallas_call(
        kernel,
        out_shape=jax.ShapeDtypeStruct((b_pad, T, P_pad), jnp.float32),
        grid_spec=pltpu.PrefetchScalarGridSpec(
            num_scalar_prefetch=0,
            grid=grid,
            in_specs=[
                pl.BlockSpec((BB, 1, nt), lambda b, k: (b, 0, k)),   # bin idx
                pl.BlockSpec((BB, 1, nt), lambda b, k: (b, 0, k)),   # pixel idx
                pl.BlockSpec((T_acc, 1), lambda b, k: (0, 0)),       # targets
            ],
            out_specs=pl.BlockSpec((BB, T, P_pad), lambda b, k: (b, 0, 0)),
            scratch_shapes=[
                pltpu.VMEM((BB, T_acc, P_pad), jnp.float32),   # histogram acc
                pltpu.VMEM((P_pad, nt), jnp.int32),            # pixel-id iota
            ],
        ),
        compiler_params=pltpu.CompilerParams(**cp),
    )(bin_in, pix_in, targets)

    if P_pad != P:
        return out[:B, :, :P]
    return out[:B]


# TODO(synk): the `poisson=True` branch (torch.bernoulli sampling), the dense
# pre-binned-input branch, and `learnable_bins` are not enabled by default and
# are left unimplemented in the kernel.


# ---------------------------------------------------------------------------
# Pure-JAX reference (mirrors the PyTorch forward, poisson=False)
# ---------------------------------------------------------------------------
def spike_encoder_reference(events, *, num_bins, height, width,
                            smooth_kernel_size=5):
    B, N, _ = events.shape
    P = height * width
    eps = 1e-5
    bin_idx, pixel_idx = _prep_indices(events, num_bins=num_bins,
                                       height=height, width=width)
    flat_idx = bin_idx * P + pixel_idx                                  # (B, N)
    counts = jax.vmap(
        lambda fi: jnp.zeros((num_bins * P,), jnp.float32).at[fi].add(1.0)
    )(flat_idx).reshape(B, num_bins, P)

    conv_mat = gaussian_conv_matrix(num_bins, smooth_kernel_size)
    smoothed = jnp.einsum('tu,bup->btp', conv_mat, counts,
                          precision=jax.lax.Precision.HIGHEST)

    mean = smoothed.mean(-1, keepdims=True)
    var = ((smoothed - mean) ** 2).mean(-1, keepdims=True)
    x = (smoothed - mean) / jnp.sqrt(var + eps)                 # affine = id

    gmean = x.mean(axis=(1, 2), keepdims=True)
    gvar = ((x - gmean) ** 2).mean(axis=(1, 2), keepdims=True)
    return (x - gmean) / jnp.sqrt(gvar + eps)


if __name__ == "__main__":
    B, N = 2, 64
    num_bins, height, width = 8, 16, 16   # P = 256

    key = jax.random.PRNGKey(0)
    kx, ky, kt, kp = jax.random.split(key, 4)
    events = jnp.stack(
        [
            jax.random.uniform(kx, (B, N), minval=0.0, maxval=float(height)),
            jax.random.uniform(ky, (B, N), minval=0.0, maxval=float(width)),
            jax.random.uniform(kt, (B, N), minval=0.0, maxval=1.0),
            jax.random.bernoulli(kp, 0.5, (B, N)).astype(jnp.float32),
        ],
        axis=-1,
    )  # (B, N, 4)

    out = spike_encoder_forward(events, num_bins=num_bins,
                                height=height, width=width)
    out = jax.block_until_ready(out)

    ref = spike_encoder_reference(events, num_bins=num_bins,
                                  height=height, width=width)
    ref = jax.block_until_ready(ref)

    assert out.shape == (B, num_bins, height * width)
    assert np.allclose(np.asarray(out), np.asarray(ref), rtol=2e-3, atol=2e-3), \
        "Pallas kernel output mismatch vs pure-JAX reference"

    print("KERNEL_OK")
</pallas_src>

<mosaic_0001>
module attributes {stable_mosaic.version = 11 : i64} {
  func.func @_spike_encoder_kernel(%arg0: i32, %arg1: i32, %arg2: memref<1x1x256xi32, #tpu.memory_space<vmem>>, %arg3: memref<1x1x256xi32, #tpu.memory_space<vmem>>, %arg4: memref<12x1xi32, #tpu.memory_space<vmem>>, %arg5: memref<1x8x256xf32, #tpu.memory_space<vmem>>, %arg6: memref<1x12x256xf32, #tpu.memory_space<vmem>>, %arg7: memref<256x256xi32, #tpu.memory_space<vmem>>) attributes {dimension_semantics = [#tpu.dimension_semantics<parallel>, #tpu.dimension_semantics<arbitrary>], iteration_bounds = array<i64: 2, 1>, scalar_prefetch = 0 : i64, scratch_operands = 2 : i64, tpu.core_type = #tpu.core_type<tc>, window_params = [{transform_indices = @transform_0, window_bounds = array<i64: 1, 1, 256>}, {transform_indices = @transform_1, window_bounds = array<i64: 1, 1, 256>}, {pipeline_mode = #tpu.pipeline_mode<synchronous>, transform_indices = @transform_2, window_bounds = array<i64: 12, 1>}, {transform_indices = @transform_3, window_bounds = array<i64: 1, 8, 256>}]} {
    %c0_i32 = arith.constant 0 : i32
    %0 = arith.cmpi eq, %arg1, %c0_i32 : i32
    %1 = arith.extui %0 : i1 to i32
    %c0_i32_0 = arith.constant 0 : i32
    %2 = arith.cmpi ne, %1, %c0_i32_0 : i32
    scf.if %2 {
      %cst_18 = arith.constant 0.000000e+00 : f32
      %30 = vector.broadcast %cst_18 : f32 to vector<1x12x256xf32>
      %c0_19 = arith.constant 0 : index
      %c0_20 = arith.constant 0 : index
      %c0_21 = arith.constant 0 : index
      %31 = vector.load %arg6[%c0_19, %c0_20, %c0_21] : memref<1x12x256xf32, #tpu.memory_space<vmem>>, vector<1x12x256xf32>
      tpu.vector_store %arg6[%c0_19, %c0_20, %c0_21], %30 {strides = array<i32>} : memref<1x12x256xf32, #tpu.memory_space<vmem>>, vector<1x12x256xf32>,
      %32 = tpu.iota {dimensions = array<i32: 0>} : vector<256x256xi32>
      %c0_22 = arith.constant 0 : index
      %c0_23 = arith.constant 0 : index
      %33 = vector.load %arg7[%c0_22, %c0_23] : memref<256x256xi32, #tpu.memory_space<vmem>>, vector<256x256xi32>
      tpu.vector_store %arg7[%c0_22, %c0_23], %32 {strides = array<i32>} : memref<256x256xi32, #tpu.memory_space<vmem>>, vector<256x256xi32>,
    } else {
    }
    %c0 = arith.constant 0 : index
    %c0_1 = arith.constant 0 : index
    %c0_2 = arith.constant 0 : index
    %3 = vector.load %arg2[%c0, %c0_1, %c0_2] : memref<1x1x256xi32, #tpu.memory_space<vmem>>, vector<1x1x256xi32>
    %4 = vector.shape_cast %3 : vector<1x1x256xi32> to vector<1x256xi32>
    %c0_3 = arith.constant 0 : index
    %c0_4 = arith.constant 0 : index
    %c0_5 = arith.constant 0 : index
    %5 = vector.load %arg3[%c0_3, %c0_4, %c0_5] : memref<1x1x256xi32, #tpu.memory_space<vmem>>, vector<1x1x256xi32>
    %6 = vector.shape_cast %5 : vector<1x1x256xi32> to vector<1x256xi32>
    %c0_6 = arith.constant 0 : index
    %c0_7 = arith.constant 0 : index
    %7 = vector.load %arg4[%c0_6, %c0_7] : memref<12x1xi32, #tpu.memory_space<vmem>>, vector<12x1xi32>
    %8 = vector.broadcast %4 : vector<1x256xi32> to vector<12x256xi32>
    %9 = vector.broadcast %7 : vector<12x1xi32> to vector<12x256xi32>
    %10 = arith.cmpi eq, %8, %9 : vector<12x256xi32>
    %11 = arith.extui %10 : vector<12x256xi1> to vector<12x256xi32>
    %12 = arith.sitofp %11 : vector<12x256xi32> to vector<12x256xf32>
    %13 = arith.truncf %12 : vector<12x256xf32> to vector<12x256xbf16>
    %c0_8 = arith.constant 0 : index
    %c0_9 = arith.constant 0 : index
    %14 = vector.load %arg7[%c0_8, %c0_9] : memref<256x256xi32, #tpu.memory_space<vmem>>, vector<256x256xi32>
    %15 = vector.broadcast %6 : vector<1x256xi32> to vector<256x256xi32>
    %16 = arith.cmpi eq, %15, %14 : vector<256x256xi32>
    %17 = arith.extui %16 : vector<256x256xi1> to vector<256x256xi32>
    %18 = arith.sitofp %17 : vector<256x256xi32> to vector<256x256xf32>
    %19 = arith.truncf %18 : vector<256x256xf32> to vector<256x256xbf16>
    %cst = arith.constant dense<0.000000e+00> : vector<12x256xf32>
    %20 = tpu.matmul %13, %19, %cst {dimension_numbers = #tpu.dot_dimension_numbers<[1], [1], [0], [0], [0, 0, 1, 0], [], []>} : vector<12x256xbf16>, vector<256x256xbf16>, vector<12x256xf32> -> vector<12x256xf32>
    %c0_10 = arith.constant 0 : index
    %c0_11 = arith.constant 0 : index
    %c0_12 = arith.constant 0 : index
    %21 = vector.load %arg6[%c0_10, %c0_11, %c0_12] : memref<1x12x256xf32, #tpu.memory_space<vmem>>, vector<1x12x256xf32>
    %22 = vector.shape_cast %21 : vector<1x12x256xf32> to vector<12x256xf32>
    %23 = arith.addf %22, %20 : vector<12x256xf32>
    %c0_13 = arith.constant 0 : index
    %c0_14 = arith.constant 0 : index
    %c0_15 = arith.constant 0 : index
    %24 = vector.load %arg6[%c0_13, %c0_14, %c0_15] : memref<1x12x256xf32, #tpu.memory_space<vmem>>, vector<1x12x256xf32>
    %25 = vector.shape_cast %24 : vector<1x12x256xf32> to vector<12x256xf32>
    %26 = vector.shape_cast %23 : vector<12x256xf32> to vector<1x12x256xf32>
    tpu.vector_store %arg6[%c0_13, %c0_14, %c0_15], %26 {strides = array<i32>} : memref<1x12x256xf32, #tpu.memory_space<vmem>>, vector<1x12x256xf32>,
    %c0_i32_16 = arith.constant 0 : i32
    %27 = arith.cmpi eq, %arg1, %c0_i32_16 : i32
    %28 = arith.extui %27 : i1 to i32
    %c0_i32_17 = arith.constant 0 : i32
    %29 = arith.cmpi ne, %28, %c0_i32_17 : i32
    scf.if %29 {
      %c0_18 = arith.constant 0 : index
      %c0_19 = arith.constant 0 : index
      %c0_20 = arith.constant 0 : index
      %30 = vector.load %arg6[%c0_18, %c0_19, %c0_20] : memref<1x12x256xf32, #tpu.memory_space<vmem>>, vector<1x12x256xf32>
      %31 = vector.shape_cast %30 : vector<1x12x256xf32> to vector<12x256xf32>
      %32 = vector.extract_strided_slice %31 {offsets = [0, 0], sizes = [8, 256], strides = [1, 1]} : vector<12x256xf32> to vector<8x256xf32>
      %cst_21 = arith.constant 0.0269131567 : f32
      %33 = vector.broadcast %cst_21 : f32 to vector<8x256xf32>
      %34 = arith.mulf %33, %32 : vector<8x256xf32>
      %35 = vector.extract_strided_slice %31 {offsets = [1, 0], sizes = [8, 256], strides = [1, 1]} : vector<12x256xf32> to vector<8x256xf32>
      %cst_22 = arith.constant 0.233367682 : f32
      %36 = vector.broadcast %cst_22 : f32 to vector<8x256xf32>
      %37 = arith.mulf %36, %35 : vector<8x256xf32>
      %38 = arith.addf %34, %37 : vector<8x256xf32>
      %39 = vector.extract_strided_slice %31 {offsets = [2, 0], sizes = [8, 256], strides = [1, 1]} : vector<12x256xf32> to vector<8x256xf32>
      %cst_23 = arith.constant 0.479438305 : f32
      %40 = vector.broadcast %cst_23 : f32 to vector<8x256xf32>
      %41 = arith.mulf %40, %39 : vector<8x256xf32>
      %42 = arith.addf %38, %41 : vector<8x256xf32>
      %43 = vector.extract_strided_slice %31 {offsets = [3, 0], sizes = [8, 256], strides = [1, 1]} : vector<12x256xf32> to vector<8x256xf32>
      %cst_24 = arith.constant 0.233367682 : f32
      %44 = vector.broadcast %cst_24 : f32 to vector<8x256xf32>
      %45 = arith.mulf %44, %43 : vector<8x256xf32>
      %46 = arith.addf %42, %45 : vector<8x256xf32>
      %47 = vector.extract_strided_slice %31 {offsets = [4, 0], sizes = [8, 256], strides = [1, 1]} : vector<12x256xf32> to vector<8x256xf32>
      %cst_25 = arith.constant 0.0269131567 : f32
      %48 = vector.broadcast %cst_25 : f32 to vector<8x256xf32>
      %49 = arith.mulf %48, %47 : vector<8x256xf32>
      %50 = arith.addf %46, %49 : vector<8x256xf32>
      %cst_26 = arith.constant dense<0.000000e+00> : vector<8xf32>
      %51 = vector.multi_reduction <add>, %50, %cst_26 [1] : vector<8x256xf32> to vector<8xf32>
      %52 = vector.shape_cast %51 : vector<8xf32> to vector<8x1xf32>
      %cst_27 = arith.constant 3.906250e-03 : f32
      %53 = vector.broadcast %cst_27 : f32 to vector<8x1xf32>
      %54 = arith.mulf %52, %53 : vector<8x1xf32>
      %55 = vector.broadcast %54 : vector<8x1xf32> to vector<8x256xf32>
      %56 = arith.subf %50, %55 : vector<8x256xf32>
      %57 = arith.mulf %56, %56 : vector<8x256xf32>
      %cst_28 = arith.constant dense<0.000000e+00> : vector<8xf32>
      %58 = vector.multi_reduction <add>, %57, %cst_28 [1] : vector<8x256xf32> to vector<8xf32>
      %59 = vector.shape_cast %58 : vector<8xf32> to vector<8x1xf32>
      %cst_29 = arith.constant 3.906250e-03 : f32
      %60 = vector.broadcast %cst_29 : f32 to vector<8x1xf32>
      %61 = arith.mulf %59, %60 : vector<8x1xf32>
      %cst_30 = arith.constant 9.99999974E-6 : f32
      %62 = vector.broadcast %cst_30 : f32 to vector<8x1xf32>
      %63 = arith.addf %61, %62 : vector<8x1xf32>
      %64 = math.rsqrt %63 : vector<8x1xf32>
      %65 = vector.broadcast %64 : vector<8x1xf32> to vector<8x256xf32>
      %66 = arith.mulf %56, %65 : vector<8x256xf32>
      %67 = vector.shape_cast %66 : vector<8x256xf32> to vector<1x8x256xf32>
      %cst_31 = arith.constant dense<0.000000e+00> : vector<1xf32>
      %68 = vector.multi_reduction <add>, %67, %cst_31 [1, 2] : vector<1x8x256xf32> to vector<1xf32>
      %69 = vector.shape_cast %68 : vector<1xf32> to vector<1x1x1xf32>
      %70 = vector.extract %69[0, 0, 0] : f32 from vector<1x1x1xf32>
      %71 = vector.broadcast %70 : f32 to vector<1x1xf32>
      %cst_32 = arith.constant 4.8828125E-4 : f32
      %72 = vector.broadcast %cst_32 : f32 to vector<1x1xf32>
      %73 = arith.mulf %71, %72 : vector<1x1xf32>
      %74 = vector.broadcast %73 : vector<1x1xf32> to vector<8x256xf32>
      %75 = arith.subf %66, %74 : vector<8x256xf32>
      %76 = arith.mulf %75, %75 : vector<8x256xf32>
      %77 = vector.shape_cast %76 : vector<8x256xf32> to vector<1x8x256xf32>
      %cst_33 = arith.constant dense<0.000000e+00> : vector<1xf32>
      %78 = vector.multi_reduction <add>, %77, %cst_33 [1, 2] : vector<1x8x256xf32> to vector<1xf32>
      %79 = vector.shape_cast %78 : vector<1xf32> to vector<1x1x1xf32>
      %80 = vector.extract %79[0, 0, 0] : f32 from vector<1x1x1xf32>
      %81 = vector.broadcast %80 : f32 to vector<1x1xf32>
      %cst_34 = arith.constant 4.8828125E-4 : f32
      %82 = vector.broadcast %cst_34 : f32 to vector<1x1xf32>
      %83 = arith.mulf %81, %82 : vector<1x1xf32>
      %cst_35 = arith.constant 9.99999974E-6 : f32
      %84 = vector.broadcast %cst_35 : f32 to vector<1x1xf32>
      %85 = arith.addf %83, %84 : vector<1x1xf32>
      %86 = math.rsqrt %85 : vector<1x1xf32>
      %87 = vector.broadcast %86 : vector<1x1xf32> to vector<8x256xf32>
      %88 = arith.mulf %75, %87 : vector<8x256xf32>
      %c0_36 = arith.constant 0 : index
      %c0_37 = arith.constant 0 : index
      %c0_38 = arith.constant 0 : index
      %89 = vector.load %arg5[%c0_36, %c0_37, %c0_38] : memref<1x8x256xf32, #tpu.memory_space<vmem>>, vector<1x8x256xf32>
      %90 = vector.shape_cast %89 : vector<1x8x256xf32> to vector<8x256xf32>
      %91 = vector.shape_cast %88 : vector<8x256xf32> to vector<1x8x256xf32>
      tpu.vector_store %arg5[%c0_36, %c0_37, %c0_38], %91 {strides = array<i32>} : memref<1x8x256xf32, #tpu.memory_space<vmem>>, vector<1x8x256xf32>,
    } else {
    }
    return
  }
  func.func @transform_0(%arg0: i32, %arg1: i32) -> (i32, i32, i32) {
    %c0_i32 = arith.constant 0 : i32
    %c0_i32_0 = arith.constant 0 : i32
    return %arg0, %c0_i32, %arg1 : i32, i32, i32
  }
  func.func @transform_1(%arg0: i32, %arg1: i32) -> (i32, i32, i32) {
    %c0_i32 = arith.constant 0 : i32
    %c0_i32_0 = arith.constant 0 : i32
    return %arg0, %c0_i32, %arg1 : i32, i32, i32
  }
  func.func @transform_2(%arg0: i32, %arg1: i32) -> (i32, i32) {
    %c0_i32 = arith.constant 0 : i32
    %c0_i32_0 = arith.constant 0 : i32
    %c0_i32_1 = arith.constant 0 : i32
    return %c0_i32, %c0_i32_0 : i32, i32
  }
  func.func @transform_3(%arg0: i32, %arg1: i32) -> (i32, i32, i32) {
    %c0_i32 = arith.constant 0 : i32
    %c0_i32_0 = arith.constant 0 : i32
    %c0_i32_1 = arith.constant 0 : i32
    return %arg0, %c0_i32, %c0_i32_0 : i32, i32, i32
  }
}

</mosaic_0001>

<bundles_post_ra>
// kernel: tpu_custom_call.1
= control target key start
LH: loop header
LB: loop body
LE: loop exit
PB: predicated region body
PF: predicated region fallthrough
CT: control target
= control target key end

     0   :  { %8 = vsyncpa [#allocation5], 0  ;;  %s1541_s0 = inlined_call_operand.vmem [shape: s32[2,1,256], index: 0, kind: input, shape index: {}]   ;;  %s1542_s1 = inlined_call_operand.vmem [shape: s32[2,1,256], index: 1, kind: input, shape index: {}]   ;;  %s1543_s2 = inlined_call_operand.vmem [shape: s32[12,1], index: 2, kind: input, shape index: {}]   ;;  %s1544_s3 = inlined_call_operand.hbm [shape: f32[2,8,256], index: 3, kind: output, shape index: {}]  }
   0x1   :  { %10 = vsyncpa [#allocation5 + $0x1], 0  ;;  %s1285_s12 = smov 0   ;;  %s1287_s13 = smov 0  }
   0x2   :  { %s1289_s14 = smov 0   ;;  %s1291_s15 = smov 0  }
   0x3   :  { %s1293_s16 = smov 0   ;;  %s1295_s17 = smov 0  }
   0x4 LB: > { %s961_s18 = sadd.s32 4294967295, %s1260_s17   ;;  %s962_s19 = sadd.s32 4294967294, %s1260_s17   ;;  %s1260_s17 = sphi %s1295_s17, %s16_s17   ;;  %s1256_s16 = sphi %s1293_s16, %s1551_s16   ;;  %s1252_s15 = sphi %s1291_s15, %s1550_s15   ;;  %s1248_s14 = sphi %s1289_s14, %s1549_s14   ;;  %s1244_s13 = sphi %s1287_s13, %s1548_s13   ;;  %s1240_s12 = sphi %s1285_s12, %s1547_s12  }
   0x5   : > { %s28_s20 = sadd.s32 1, %s1256_s16  ;;  %s112_s21 = sadd.s32 1, %s1248_s14 }
   0x6   : > { %p30_p0 = scmp.ge.s32.totalorder %s28_s20, 2  ;;  %p122_p1 = scmp.ne.s32.totalorder %s1248_s14, %s1244_s13 }
   0x7   : > { %p123_p2 = scmp.eq.s32.totalorder %s961_s18, 1  ;;  %p128_p3 = scmp.ne.s32.totalorder %s1244_s13, %s1240_s12 }
   0x8   : > { %s1553_s20 = smov (%p30_p0, %s28_s20), 0  ;;  %p129_p5 = scmp.eq.s32.totalorder %s962_s19, 1 }
   0x9   : > { %p1325_p4 = por %p123_p2, %p122_p1  ;;  %s109_s23 = ssub.s32 %s1256_s16, %s1553_s20 }
   0xa   : > { %p965_p6 = scmp.ge.s32.totalorder %s1260_s17, 1  ;;  %p110_p7 = scmp.eq.s32.totalorder %s109_s23, 0 }
   0xb   : > { %p1332_p8 = por %p129_p5, %p128_p3  ;;  %p174_p9 = scmp.lt.s32.totalorder %s1260_s17, 3 }
   0xc   : > { %s1338_s25 = scalar_select %p110_p7, %s1248_s14, %s112_s21  }
   0xd   : > { %p175_p10 = pnand %p965_p6, %p174_p9 }
   0xe   : > { %p210_p11 = scmp.lt.s32.totalorder (!%p175_p10), %s1252_s15, 1  ;;  %s206_s19 = sand.u32 (!%p175_p10), 1, %s1244_s13  }
   0xf   : > { %178 = sbr.rel (%p175_p10) target bundleno = 975 (0x3cf), region = 32  ;;  %s966_s21 = sshll.u32 (!%p175_p10), %s206_s19, 4 }
  0x10   : > { %s1114_s23 = sshll.u32 (!%p175_p10), %s1252_s15, 4  ;;  %s1202_s9 = scalar_lea.hbm (!%p175_p10), %s1544_s3, 32 }
  0x14   : > { %v334_v0 = vld [vmem:[%s1543_s2] sm:$0xff]  ;;  %v235_v1 = vlaneseq  ;;  %v1262_v2 = vmov 0   ;;  %s1345_s28 = scalar_select %p210_p11, %s1252_s15, 1  ;;  %v335_v9 = vld [vmem:[%s1543_s2 + $0x8] sm:$0xf]  ;;  %v1264_v45 = vmov 0.0  }
  0x15   : > { %1177 = vset.pattern.permute.xlu0 %v1262_v2  ;;  %v1263_v14 = vmov 1.0|1.0   ;;  %233 = vst [vmem:[#allocation2 + $0x18] sm:$0xf] %v1264_v45  ;;  %s860_s15 = scalar_lea.sflag [#allocation5], %s206_s19 }
  0x16   : > { %339 = vperm.xlu0 %1177, %v334_v0   ;;  %v1347_v3 = vshrl.u32 %v235_v1, 7  ;;  %s967_s29 = sshll.u32 %s1345_s28, 1  ;;  %234 = vst [vmem:[#allocation2 + $0x8] sm:$0xf] %v1264_v45  ;;  %s871_s28 = scalar_lea.hbm %s1544_s3, %s1114_s23 }
  0x17   : > { %s225_s5 = scalar_lea.vmem %s1542_s1, %s967_s29  ;;  %s216_s10 = scalar_lea.vmem %s1541_s0, %s967_s29 }
  0x18   : > { %v250_v4 = vadd.s32 112, %v1347_v3  ;;  %v251_v5 = vadd.s32 120, %v1347_v3  ;;  %v333_v6 = vld [vmem:[%s225_s5] sm:$0x3]  ;;  %v266_v7 = vadd.s32 240, %v1347_v3  ;;  %v267_v8 = vadd.s32 248, %v1347_v3 }
  0x19   : > { %v1362_v10 = vperm.slane %v333_v6, 0  ;;  %v1364_v11 = vperm.slane %v333_v6, 1  ;;  %v248_v12 = vadd.s32 96, %v1347_v3  ;;  %v249_v13 = vadd.s32 104, %v1347_v3  ;;  %v332_v41 = vld [vmem:[%s216_s10] sm:$0x3] }
  0x1a   : > { %v264_v15 = vadd.s32 224, %v1347_v3  ;;  %v265_v16 = vadd.s32 232, %v1347_v3  ;;  %v246_v17 = vadd.s32 80, %v1347_v3  ;;  %v247_v18 = vadd.s32 88, %v1347_v3  ;;  %s208_s29 = scalar_lea.vmem [#allocation4], %s966_s21  ;;  %s875_s4 = sshll.u32 %s871_s28, 4  ;;  %s876_s4 = int_to_ptr.hbm [resolvable:$true] %s875_s4 }
  0x1b   : > { %vm452_vm0 = vcmp.eq.s32.totalorder %v1362_v10, %v250_v4  ;;  %vm454_vm1 = vcmp.eq.s32.totalorder %v1362_v10, %v251_v5  ;;  %vm453_vm2 = vcmp.eq.s32.totalorder %v1364_v11, %v250_v4  ;;  %vm455_vm3 = vcmp.eq.s32.totalorder %v1364_v11, %v251_v5  ;;  %s873_s30 = sshll.u32 %s208_s29, 4  ;;  %s1196_s5 = sshra.s32 %s876_s4, 4  ;;  %s874_s30 = int_to_ptr.vmem [resolvable:$true] %s873_s30  ;;  %s1197_s5 = int_to_ptr.hbm [resolvable:$true] %s1196_s5 }
  0x1c   : > { %vm1037_vm4 = vmpackc.low %vm454_vm1, %vm452_vm0  ;;  %vm484_vm5 = vcmp.eq.s32.totalorder %v1362_v10, %v266_v7  ;;  %vm486_vm6 = vcmp.eq.s32.totalorder %v1362_v10, %v267_v8  ;;  %vm485_vm7 = vcmp.eq.s32.totalorder %v1364_v11, %v266_v7  ;;  %vm487_vm8 = vcmp.eq.s32.totalorder %v1364_v11, %v267_v8  ;;  %v706_v54 = vld [vmem:[#allocation2 + $0x18] sm:$0xf]  ;;  %s1198_s6 = scalar_lea.hbm %s1197_s5, 16  ;;  %p1203_p1 = scmp.lt.s32.totalorder %s1197_s5, %s1544_s3 }
  0x1d   : > { %1038 = vmatpush.bf16.xpose.msk.msra.mxu0 %vm1037_vm4, %v1263_v14  ;;  %vm1055_vm9 = vmpackc.low %vm455_vm3, %vm453_vm2  ;;  %vm448_vm12 = vcmp.eq.s32.totalorder %v1362_v10, %v248_v12  ;;  %vm450_vm13 = vcmp.eq.s32.totalorder %v1362_v10, %v249_v13  ;;  %vm449_vm14 = vcmp.eq.s32.totalorder %v1364_v11, %v248_v12  ;;  %vm451_vm15 = vcmp.eq.s32.totalorder %v1364_v11, %v249_v13  ;;  %v707_v59 = vld [vmem:[#allocation2 + $0x8] sm:$0xf]  ;;  %p1199_p12 = scmp.ne.s32.totalorder %s1197_s5, %s1198_s6  ;;  %p1204_p2 = scmp.lt.s32.totalorder %s1202_s9, %s1198_s6 }
  0x1e   : > { %342 = vperm.xlu0 %1177, %v335_v9   ;;  %1056 = vmatpush.bf16.xpose.msk.msra.mxu1 %vm1055_vm9, %v1263_v14  ;;  %vm1073_vm10 = vmpackc.low %vm486_vm6, %vm484_vm5  ;;  %vm480_vm0 = vcmp.eq.s32.totalorder %v1362_v10, %v264_v15  ;;  %vm482_vm1 = vcmp.eq.s32.totalorder %v1362_v10, %v265_v16  ;;  %vm481_vm3 = vcmp.eq.s32.totalorder %v1364_v11, %v264_v15  ;;  %v262_v19 = vadd.s32 208, %v1347_v3 }
  0x1f   : > { %1074 = vmatpush.bf16.xpose.msk.msra.mxu2 %vm1073_vm10, %v1263_v14  ;;  %vm1091_vm11 = vmpackc.low %vm487_vm8, %vm485_vm7  ;;  %vm483_vm4 = vcmp.eq.s32.totalorder %v1364_v11, %v265_v16  ;;  %v263_v20 = vadd.s32 216, %v1347_v3  ;;  %vm444_vm8 = vcmp.eq.s32.totalorder %v1362_v10, %v246_v17  ;;  %vm446_vm9 = vcmp.eq.s32.totalorder %v1362_v10, %v247_v18  ;;  %p1200_p13 = pnand %p1199_p12, %p1325_p4  ;;  %p1205_p3 = por %p1204_p2, %p1203_p1 }
  0x20   : > { %1092 = vmatpush.bf16.xpose.msk.msra.mxu3 %vm1091_vm11, %v1263_v14  ;;  %vm1039_vm2 = vmpackc.low %vm450_vm13, %vm448_vm12  ;;  %vm445_vm10 = vcmp.eq.s32.totalorder %v1364_v11, %v246_v17  ;;  %vm447_vm11 = vcmp.eq.s32.totalorder %v1364_v11, %v247_v18  ;;  %vm476_vm12 = vcmp.eq.s32.totalorder %v1362_v10, %v262_v19  ;;  %v244_v21 = vadd.s32 64, %v1347_v3 }
  0x21   : > { %vm1057_vm5 = vmpackc.low %vm451_vm15, %vm449_vm14  ;;  %vm478_vm13 = vcmp.eq.s32.totalorder %v1362_v10, %v263_v20  ;;  %vm477_vm15 = vcmp.eq.s32.totalorder %v1364_v11, %v262_v19  ;;  %v245_v22 = vadd.s32 72, %v1347_v3  ;;  %v260_v23 = vadd.s32 192, %v1347_v3  ;;  %p1201_p0 = pneg %p1200_p13 }
  0x22   : > { %vm1075_vm6 = vmpackc.low %vm482_vm1, %vm480_vm0  ;;  %vm479_vm0 = vcmp.eq.s32.totalorder %v1364_v11, %v263_v20  ;;  %v261_v24 = vadd.s32 200, %v1347_v3  ;;  %v242_v25 = vadd.s32 48, %v1347_v3  ;;  %v243_v26 = vadd.s32 56, %v1347_v3 }
  0x23   : > { %vm1093_vm7 = vmpackc.low %vm483_vm4, %vm481_vm3  ;;  %vm440_vm4 = vcmp.eq.s32.totalorder %v1362_v10, %v244_v21  ;;  %v258_v27 = vadd.s32 176, %v1347_v3  ;;  %v259_v28 = vadd.s32 184, %v1347_v3  ;;  %v240_v29 = vadd.s32 32, %v1347_v3  ;;  %p1206_p5 = pnand %p1205_p3, %p1201_p0 }
  0x24   : > { %vm1041_vm14 = vmpackc.low %vm446_vm9, %vm444_vm8  ;;  %vm472_vm8 = vcmp.eq.s32.totalorder %v1362_v10, %v260_v23  ;;  %vm474_vm9 = vcmp.eq.s32.totalorder %v1362_v10, %v261_v24  ;;  %v241_v30 = vadd.s32 40, %v1347_v3  ;;  %v256_v31 = vadd.s32 160, %v1347_v3 }
  0x25   : > { %1040 = vmatpush.bf16.xpose.msk.msra.mxu0 %vm1039_vm2, %v1263_v14  ;;  %vm1059_vm1 = vmpackc.low %vm447_vm11, %vm445_vm10  ;;  %vm473_vm11 = vcmp.eq.s32.totalorder %v1364_v11, %v260_v23  ;;  %v257_v32 = vadd.s32 168, %v1347_v3  ;;  %v238_v33 = vadd.s32 16, %v1347_v3  ;;  %v239_v34 = vadd.s32 24, %v1347_v3 }
  0x26   : > { %1058 = vmatpush.bf16.xpose.msk.msra.mxu1 %vm1057_vm5, %v1263_v14  ;;  %vm1077_vm2 = vmpackc.low %vm478_vm13, %vm476_vm12  ;;  %vm442_vm5 = vcmp.eq.s32.totalorder %v1362_v10, %v245_v22  ;;  %vm475_vm12 = vcmp.eq.s32.totalorder %v1364_v11, %v261_v24  ;;  %v254_v35 = vadd.s32 144, %v1347_v3  ;;  %v255_v36 = vadd.s32 152, %v1347_v3 }
  0x27   : > { %1076 = vmatpush.bf16.xpose.msk.msra.mxu2 %vm1075_vm6, %v1263_v14  ;;  %vm1095_vm3 = vmpackc.low %vm479_vm0, %vm477_vm15  ;;  %vm441_vm6 = vcmp.eq.s32.totalorder %v1364_v11, %v244_v21  ;;  %vm436_vm0 = vcmp.eq.s32.totalorder %v1362_v10, %v242_v25  ;;  %v237_v37 = vadd.s32 8, %v1347_v3  ;;  %v252_v38 = vadd.s32 128, %v1347_v3 }
  0x28   : > { %1094 = vmatpush.bf16.xpose.msk.msra.mxu3 %vm1093_vm7, %v1263_v14  ;;  %vm443_vm7 = vcmp.eq.s32.totalorder %v1364_v11, %v245_v22  ;;  %vm1043_vm10 = vmpackc.low %vm442_vm5, %vm440_vm4  ;;  %vm468_vm4 = vcmp.eq.s32.totalorder %v1362_v10, %v258_v27  ;;  %vm470_vm5 = vcmp.eq.s32.totalorder %v1362_v10, %v259_v28  ;;  %v253_v39 = vadd.s32 136, %v1347_v3 }
  0x29   : > { %vm1061_vm13 = vmpackc.low %vm443_vm7, %vm441_vm6  ;;  %vm469_vm7 = vcmp.eq.s32.totalorder %v1364_v11, %v258_v27  ;;  %v336_v42 = vperm.slane %v332_v41, 0  ;;  %v337_v43 = vperm.slane %v332_v41, 1 }
  0x2a   : > { %vm1097_vm15 = vmpackc.low %vm475_vm12, %vm473_vm11  ;;  %vm432_vm12 = vcmp.eq.s32.totalorder %v1362_v10, %v240_v29 }
  0x2d   : > { %1042 = vmatpush.bf16.xpose.msk.msra.mxu0 %vm1041_vm14, %v1263_v14  ;;  %vm1079_vm14 = vmpackc.low %vm474_vm9, %vm472_vm8  ;;  %vm471_vm8 = vcmp.eq.s32.totalorder %v1364_v11, %v259_v28 }
  0x2e   : > { %1060 = vmatpush.bf16.xpose.msk.msra.mxu1 %vm1059_vm1, %v1263_v14  ;;  %vm438_vm1 = vcmp.eq.s32.totalorder %v1362_v10, %v243_v26  ;;  %vm1099_vm11 = vmpackc.low %vm471_vm8, %vm469_vm7  ;;  %vm428_vm8 = vcmp.eq.s32.totalorder %v1362_v10, %v238_v33 }
  0x2f   : > { %1078 = vmatpush.bf16.xpose.msk.msra.mxu2 %vm1077_vm2, %v1263_v14  ;;  %vm437_vm2 = vcmp.eq.s32.totalorder %v1364_v11, %v242_v25  ;;  %vm1045_vm6 = vmpackc.low %vm438_vm1, %vm436_vm0  ;;  %vm464_vm0 = vcmp.eq.s32.totalorder %v1362_v10, %v256_v31  ;;  %vm466_vm1 = vcmp.eq.s32.totalorder %v1362_v10, %v257_v32 }
  0x30   : > { %1096 = vmatpush.bf16.xpose.msk.msra.mxu3 %vm1095_vm3, %v1263_v14  ;;  %vm439_vm3 = vcmp.eq.s32.totalorder %v1364_v11, %v243_v26 }
  0x31   : > { %vm1063_vm9 = vmpackc.low %vm439_vm3, %vm437_vm2  ;;  %vm465_vm3 = vcmp.eq.s32.totalorder %v1364_v11, %v256_v31 }
  0x35   : > { %1044 = vmatpush.bf16.xpose.msk.msra.mxu0 %vm1043_vm10, %v1263_v14  ;;  %vm1081_vm10 = vmpackc.low %vm470_vm5, %vm468_vm4  ;;  %vm467_vm4 = vcmp.eq.s32.totalorder %v1364_v11, %v257_v32 }
  0x36   : > { %1062 = vmatpush.bf16.xpose.msk.msra.mxu1 %vm1061_vm13, %v1263_v14  ;;  %vm434_vm13 = vcmp.eq.s32.totalorder %v1362_v10, %v241_v30  ;;  %vm1101_vm7 = vmpackc.low %vm467_vm4, %vm465_vm3  ;;  %vm424_vm4 = vcmp.eq.s32.totalorder %v1362_v10, %v1347_v3 }
  0x37   : > { %1080 = vmatpush.bf16.xpose.msk.msra.mxu2 %vm1079_vm14, %v1263_v14  ;;  %vm433_vm14 = vcmp.eq.s32.totalorder %v1364_v11, %v240_v29  ;;  %vm1047_vm2 = vmpackc.low %vm434_vm13, %vm432_vm12  ;;  %vm460_vm12 = vcmp.eq.s32.totalorder %v1362_v10, %v254_v35  ;;  %vm462_vm13 = vcmp.eq.s32.totalorder %v1362_v10, %v255_v36 }
  0x38   : > { %1098 = vmatpush.bf16.xpose.msk.msra.mxu3 %vm1097_vm15, %v1263_v14  ;;  %vm435_vm15 = vcmp.eq.s32.totalorder %v1364_v11, %v241_v30 }
  0x39   : > { %vm1065_vm5 = vmpackc.low %vm435_vm15, %vm433_vm14  ;;  %vm461_vm15 = vcmp.eq.s32.totalorder %v1364_v11, %v254_v35 }
  0x3d   : > { %1046 = vmatpush.bf16.xpose.msk.msra.mxu0 %vm1045_vm6, %v1263_v14  ;;  %vm1083_vm6 = vmpackc.low %vm466_vm1, %vm464_vm0  ;;  %vm463_vm0 = vcmp.eq.s32.totalorder %v1364_v11, %v255_v36 }
  0x3e   : > { %1064 = vmatpush.bf16.xpose.msk.msra.mxu1 %vm1063_vm9, %v1263_v14  ;;  %vm430_vm9 = vcmp.eq.s32.totalorder %v1362_v10, %v239_v34  ;;  %vm1103_vm3 = vmpackc.low %vm463_vm0, %vm461_vm15 }
  0x3f   : > { %1082 = vmatpush.bf16.xpose.msk.msra.mxu2 %vm1081_vm10, %v1263_v14  ;;  %vm429_vm10 = vcmp.eq.s32.totalorder %v1364_v11, %v238_v33  ;;  %vm1049_vm14 = vmpackc.low %vm430_vm9, %vm428_vm8  ;;  %vm456_vm8 = vcmp.eq.s32.totalorder %v1362_v10, %v252_v38  ;;  %vm458_vm9 = vcmp.eq.s32.totalorder %v1362_v10, %v253_v39 }
  0x40   : > { %1100 = vmatpush.bf16.xpose.msk.msra.mxu3 %vm1099_vm11, %v1263_v14  ;;  %vm431_vm11 = vcmp.eq.s32.totalorder %v1364_v11, %v239_v34 }
  0x41   : > { %vm1067_vm1 = vmpackc.low %vm431_vm11, %vm429_vm10  ;;  %vm457_vm11 = vcmp.eq.s32.totalorder %v1364_v11, %v252_v38 }
  0x45   : > { %1048 = vmatpush.bf16.xpose.msk.msra.mxu0 %vm1047_vm2, %v1263_v14  ;;  %vm1085_vm2 = vmpackc.low %vm462_vm13, %vm460_vm12  ;;  %vm459_vm12 = vcmp.eq.s32.totalorder %v1364_v11, %v253_v39 }
  0x46   : > { %1066 = vmatpush.bf16.xpose.msk.msra.mxu1 %vm1065_vm5, %v1263_v14  ;;  %vm425_vm5 = vcmp.eq.s32.totalorder %v1364_v11, %v1347_v3  ;;  %vm1105_vm15 = vmpackc.low %vm459_vm12, %vm457_vm11 }
  0x47   : > { %1084 = vmatpush.bf16.xpose.msk.msra.mxu2 %vm1083_vm6, %v1263_v14  ;;  %vm426_vm6 = vcmp.eq.s32.totalorder %v1362_v10, %v237_v37 }
  0x48   : > { %1102 = vmatpush.bf16.xpose.msk.msra.mxu3 %vm1101_vm7, %v1263_v14  ;;  %vm427_vm7 = vcmp.eq.s32.totalorder %v1364_v11, %v237_v37  ;;  %vm1051_vm10 = vmpackc.low %vm426_vm6, %vm424_vm4  ;;  %vm733_vm6 = vcmask 1046528  }
  0x49   : > { %vm1069_vm13 = vmpackc.low %vm427_vm7, %vm425_vm5  ;;  %vm752_vm7 = vcmask 1045504  }
  0x4d   : > { %1050 = vmatpush.bf16.xpose.msk.msra.mxu0 %vm1049_vm14, %v1263_v14  ;;  %vm1087_vm14 = vmpackc.low %vm458_vm9, %vm456_vm8  ;;  %vm763_vm8 = vcmask 1044480   ;;  %vm780_vm9 = vcmask 1043456  }
  0x4e   : > { %1068 = vmatpush.bf16.xpose.msk.msra.mxu1 %vm1067_vm1, %v1263_v14 }
  0x4f   : > { %1086 = vmatpush.bf16.xpose.msk.msra.mxu2 %vm1085_vm2, %v1263_v14 }
  0x50   : > { %1104 = vmatpush.bf16.xpose.msk.msra.mxu3 %vm1103_vm3, %v1263_v14 }
  0x55   : > { %1052 = vmatpush.bf16.xpose.msk.msra.mxu0 %vm1051_vm10, %v1263_v14 }
  0x56   : > { %1070 = vmatpush.bf16.xpose.msk.msra.mxu1 %vm1069_vm13, %v1263_v14 }
  0x57   : > { %1088 = vmatpush.bf16.xpose.msk.msra.mxu2 %vm1087_vm14, %v1263_v14 }
  0x58   : > { %1106 = vmatpush.bf16.xpose.msk.msra.mxu3 %vm1105_vm15, %v1263_v14 }
  0x88   : > { %v340_v40 = vpop.permute.xlu0 %339 }
  0x89   : > { %vm344_vm0 = vcmp.eq.s32.totalorder %v336_v42, %v340_v40  ;;  %vm345_vm3 = vcmp.eq.s32.totalorder %v337_v43, %v340_v40 }
  0x90   : > { %v343_v44 = vpop.permute.xlu0 %342 }
  0x91   : > { %vm346_vm1 = vcmp.eq.s32.totalorder %v336_v42, %v343_v44  ;;  %vm347_vm2 = vcmp.eq.s32.totalorder %v337_v43, %v343_v44 }
  0x92   : > { %vm1053_vm4 = vmpackc.low %vm346_vm1, %vm344_vm0 }
  0x93   : > { %vm1071_vm5 = vmpackc.low %vm347_vm2, %vm345_vm3  ;;  %1054 = vmatmul.msk.bf16.vlgmr.msra.gmra.mxu0 %vm1053_vm4, %v1263_v14  ;;  %1090 = vmatmul.msk.bf16.vlgmr.msra.gmra.mxu2 %vm1053_vm4, %v1263_v14 }
  0x94   : > { %1072 = vmatmul.msk.bf16.vlgmr.msra.gmra.mxu1 %vm1071_vm5, %v1263_v14  ;;  %1108 = vmatmul.msk.bf16.vlgmr.msra.gmra.mxu3 %vm1071_vm5, %v1263_v14 }
 0x110   : > { %v657_v46 = vpop.f32.mrf.mxu0 }
 0x111   : > { %v671_v47 = vpop.f32.mrf.mxu1 }
 0x112   : > { %v672_v48 = vadd.f32 %v671_v47, %v657_v46 }
 0x114   : > { %v725_v62 = vmul.f32 0.23336768, %v672_v48  ;;  %v744_v2 = vmul.f32 0.4794383, %v672_v48  ;;  %v723_v5 = vmul.f32 0.026913157, %v672_v48 }
 0x116   : > { %v685_v49 = vpop.f32.mrf.mxu2  ;;  %v734_v3 = vrot.slane %v725_v62, 1  ;;  %v753_v11 = vrot.slane %v744_v2, 2  ;;  %v764_v26 = vrot.slane %v725_v62, 3  ;;  %v781_v37 = vrot.slane %v723_v5, 4 }
 0x117   : > { %v699_v50 = vpop.f32.mrf.mxu3 }
 0x118   : > { %v700_v51 = vadd.f32 %v699_v50, %v685_v49  ;;  %v659_v52 = vpop.f32.mrf.mxu0 }
 0x119   : > { %v673_v53 = vpop.f32.mrf.mxu1 }
 0x11a   : > { %v674_v55 = vadd.f32 %v673_v53, %v659_v52  ;;  %v726_v6 = vmul.f32 0.23336768, %v700_v51  ;;  %v745_v13 = vmul.f32 0.4794383, %v700_v51  ;;  %v724_v22 = vmul.f32 0.026913157, %v700_v51 }
 0x11c   : > { %v710_v56 = vadd.f32 %v706_v54, %v674_v55  ;;  %v737_v15 = vrot.slane %v726_v6, 1  ;;  %v756_v25 = vrot.slane %v745_v13, 2  ;;  %v767_v29 = vrot.slane %v726_v6, 3 }
 0x11d   : > { %v784_v38 = vrot.slane %v724_v22, 4 }
 0x11e   : > { %714 = vst [vmem:[#allocation2 + $0x18] sm:$0xf] %v710_v56  ;;  %v687_v57 = vpop.f32.mrf.mxu2 }
 0x11f   : > { %v701_v58 = vpop.f32.mrf.mxu3 }
 0x120   : > { %v702_v60 = vadd.f32 %v701_v58, %v687_v57 }
 0x122   : > { %v711_v61 = vadd.f32 %v707_v59, %v702_v60 }
 0x124   : > { %715 = vst [vmem:[#allocation2 + $0x8] sm:$0xf] %v711_v61 }
 0x125   : > { %v721_v63 = vld [vmem:[#allocation2 + $0x18] sm:$0xf] }
 0x126   : > { %v727_v0 = vmul.f32 0.23336768, %v721_v63  ;;  %v746_v1 = vmul.f32 0.4794383, %v721_v63  ;;  %v774_v17 = vmul.f32 0.026913157, %v721_v63 }
 0x128   : > { %v735_v4 = vrot.slane %v727_v0, 1  ;;  %v754_v8 = vrot.slane %v746_v1, 2  ;;  %v765_v16 = vrot.slane %v727_v0, 3  ;;  %v782_v32 = vrot.slane %v774_v17, 4 }
 0x12a   : > { %v736_v7 = vsel %vm733_vm6, %v734_v3, %v735_v4  ;;  %v755_v19 = vsel %vm752_vm7, %v753_v11, %v754_v8  ;;  %v766_v31 = vsel %vm763_vm8, %v764_v26, %v765_v16  ;;  %v783_v40 = vsel %vm780_vm9, %v781_v37, %v782_v32 }
 0x12b   : > { %v722_v9 = vld [vmem:[#allocation2 + $0x8] sm:$0xf]  ;;  %v742_v10 = vadd.f32 %v736_v7, %v723_v5 }
 0x12c   : > { %v728_v12 = vmul.f32 0.23336768, %v722_v9  ;;  %v747_v14 = vmul.f32 0.4794383, %v722_v9  ;;  %v775_v21 = vmul.f32 0.026913157, %v722_v9 }
 0x12d   : > { %v761_v23 = vadd.f32 %v755_v19, %v742_v10 }
 0x12e   : > { %v738_v18 = vrot.slane %v728_v12, 1  ;;  %v757_v20 = vrot.slane %v747_v14, 2  ;;  %v768_v27 = vrot.slane %v728_v12, 3  ;;  %v785_v33 = vrot.slane %v775_v21, 4 }
 0x12f   : > { %v772_v35 = vadd.f32 %v766_v31, %v761_v23 }
 0x130   : > { %v739_v24 = vsel %vm733_vm6, %v737_v15, %v738_v18  ;;  %v758_v30 = vsel %vm752_vm7, %v756_v25, %v757_v20  ;;  %v769_v36 = vsel %vm763_vm8, %v767_v29, %v768_v27  ;;  %v786_v41 = vsel %vm780_vm9, %v784_v38, %v785_v33 }
 0x131   : > { %v743_v28 = vadd.f32 %v739_v24, %v724_v22  ;;  %v789_v42 = vadd.f32 %v783_v40, %v772_v35 }
 0x133   : > { %v762_v34 = vadd.f32 %v758_v30, %v743_v28 }
 0x135   : > { %v773_v39 = vadd.f32 %v769_v36, %v762_v34 }
 0x137   : > { %v790_v43 = vadd.f32 %v786_v41, %v773_v39 }
 0x139   : > { %v791_v44 = vadd.f32 %v790_v43, %v789_v42 }
 0x13b   : > { %792 = vadd.xlane.f32.xlu1 %v791_v44 }
 0x1ae   : > { %v793_v45 = vpop.xlane.xlu1 %792 }
 0x1af   : > { %v794_v46 = vmul.f32 0.00390625, %v793_v45 }
 0x1b1   : > { %v795_v47 = vsub.f32 %v789_v42, %v794_v46  ;;  %v796_v48 = vsub.f32 %v790_v43, %v794_v46 }
 0x1b3   : > { %v797_v49 = vmul.f32 %v795_v47, %v795_v47  ;;  %v798_v50 = vmul.f32 %v796_v48, %v796_v48 }
 0x1b5   : > { %v799_v51 = vadd.f32 %v798_v50, %v797_v49 }
 0x1b7   : > { %800 = vadd.xlane.f32.xlu1 %v799_v51 }
 0x22a   : > { %v801_v52 = vpop.xlane.xlu1 %800 }
 0x22b   : > { %v802_v53 = vmul.f32 0.00390625, %v801_v52 }
 0x22d   : > { %v803_v54 = vadd.f32 1e-05, %v802_v53 }
 0x22f   : > { %1178 = vrsqrt.f32 %v803_v54  ;;  %vm810_vm11 = vweird.f32 %v803_v54 }
 0x235   : > { %v1179_v55 = vpop.eup %1178 }
 0x236   : > { %v805_v56 = vmul.f32 %v1179_v55, %v803_v54  ;;  %vm811_vm10 = vweird.f32 %v1179_v55 }
 0x237   : > { %vm812_vm12 = vmor %vm810_vm11, %vm811_vm10 }
 0x238   : > { %v806_v57 = vmul.f32 %v1179_v55, %v805_v56 }
 0x23a   : > { %v807_v58 = vmul.f32 0.5, %v806_v57 }
 0x23c   : > { %v808_v59 = vsub.f32 1.5, %v807_v58 }
 0x23e   : > { %v809_v60 = vmul.f32 %v1179_v55, %v808_v59 }
 0x240   : > { %v813_v61 = vsel %vm812_vm12, %v1179_v55, %v809_v60 }
 0x241   : > { %v814_v62 = vmul.f32 %v813_v61, %v795_v47  ;;  %v815_v63 = vmul.f32 %v813_v61, %v796_v48 }
 0x243   : > { %v816_v0 = vadd.f32 %v815_v63, %v814_v62 }
 0x245   : > { %817 = vadd.xlane.f32.xlu2 %v816_v0 }
 0x2b8   : > { %v818_v1 = vpop.xlane.xlu2 %817 }
 0x2b9   : > { %v819_v2 = vrot.slane %v818_v1, 4 }
 0x2bb   : > { %v820_v3 = vadd.f32 %v819_v2, %v818_v1 }
 0x2bd   : > { %v821_v4 = vrot.slane %v820_v3, 2 }
 0x2bf   : > { %v822_v5 = vadd.f32 %v821_v4, %v820_v3 }
 0x2c1   : > { %v823_v6 = vrot.slane %v822_v5, 1 }
 0x2c3   : > { %v824_v7 = vadd.f32 %v823_v6, %v822_v5 }
 0x2c5   : > { %1115 = vpush %v824_v7 }
 0x2f6   : > { %s1116_s11 = spop %1115 }
 0x2f7   : > { %v826_v8 = vstv %s1116_s11 }
 0x2f8   : > { %v827_v9 = vmul.f32 0.00048828125, %v826_v8 }
 0x2fa   : > { %v828_v10 = vsub.f32 %v814_v62, %v827_v9  ;;  %v829_v11 = vsub.f32 %v815_v63, %v827_v9 }
 0x2fc   : > { %v830_v12 = vmul.f32 %v828_v10, %v828_v10  ;;  %v831_v13 = vmul.f32 %v829_v11, %v829_v11 }
 0x2fe   : > { %v832_v14 = vadd.f32 %v831_v13, %v830_v12 }
 0x300   : > { %833 = vadd.xlane.f32.xlu2 %v832_v14 }
 0x373   : > { %v834_v15 = vpop.xlane.xlu2 %833 }
 0x374   : > { %v835_v16 = vrot.slane %v834_v15, 4 }
 0x376   : > { %v836_v17 = vadd.f32 %v835_v16, %v834_v15 }
 0x378   : > { %v837_v18 = vrot.slane %v836_v17, 2 }
 0x37a   : > { %v838_v19 = vadd.f32 %v837_v18, %v836_v17 }
 0x37c   : > { %v839_v20 = vrot.slane %v838_v19, 1 }
 0x37e   : > { %v840_v21 = vadd.f32 %v839_v20, %v838_v19 }
 0x380   : > { %1117 = vpush %v840_v21 }
 0x3b1   : > { %s1118_s18 = spop %1117 }
 0x3b2   : > { %v842_v22 = vstv %s1118_s18 }
 0x3b3   : > { %v843_v23 = vmul.f32 0.00048828125, %v842_v22 }
 0x3b5   : > { %v844_v24 = vadd.f32 1e-05, %v843_v23 }
 0x3b7   : > { %1180 = vrsqrt.f32 %v844_v24  ;;  %vm851_vm14 = vweird.f32 %v844_v24 }
 0x3bd   : > { %v1181_v25 = vpop.eup %1180 }
 0x3be   : > { %v846_v26 = vmul.f32 %v1181_v25, %v844_v24  ;;  %vm852_vm13 = vweird.f32 %v1181_v25 }
 0x3bf   : > { %vm853_vm15 = vmor %vm851_vm14, %vm852_vm13 }
 0x3c0   : > { %v847_v27 = vmul.f32 %v1181_v25, %v846_v26 }
 0x3c2   : > { %v848_v28 = vmul.f32 0.5, %v847_v27 }
 0x3c4   : > { %v849_v29 = vsub.f32 1.5, %v848_v28 }
 0x3c6   : > { %v850_v30 = vmul.f32 %v1181_v25, %v849_v29 }
 0x3c8   : > { %v854_v31 = vsel %vm853_vm15, %v1181_v25, %v850_v30 }
 0x3c9   : > { %v855_v32 = vmul.f32 %v854_v31, %v828_v10  ;;  %v856_v33 = vmul.f32 %v854_v31, %v829_v11 }
 0x3cb   : > { %857 = vst [vmem:[%s208_s29] sm:$0xff] %v855_v32 }
 0x3cc   : > { %858 = vst [vmem:[%s208_s29 + $0x8] sm:$0xff] %v856_v33 }
 0x3cd   : > { %1209 = shalt.err (!%p1206_p5)
}
 0x3ce   : > { %1119 = dma.vmem_to_hbm [thread:$0]  (%p1325_p4), %s874_s30, 256, %s876_s4, %s860_s15  }
 0x3cf PF: > { %p1125_p6 = scmp.ge.s32.totalorder %s1260_s17, 2  ;;  %s887_s18 = sand.u32 1, %s1240_s12  }
 0x3d0   : > { %s888_s19 = scalar_lea.sflag [#allocation5], %s887_s18 }
 0x3d1   : > { %p1122_p7 = pnand %p1125_p6, %p1332_p8 }
 0x3d3   : > { %p1123_p9 = pneg %p1122_p7 }
 0x3d5   : > { %1235 = dma.done.wait (%p1123_p9), %s888_s19, 256  }
 0x3d6   : > { %1237 = vsyncadd (%p1123_p9), %s888_s19, 4294967040  ;;  %s16_s17 = sadd.s32 1, %s1260_s17   ;;  %s1547_s12 = smov %s1244_s13 }
 0x3d7   : > { %p13_p10 = scmp.ge.s32.totalorder %s16_s17, 4   ;;  %s1548_s13 = smov %s1248_s14 }
 0x3d8   : > { %s1549_s14 = smov %s1338_s25  ;;  %s1550_s15 = smov %s1256_s16 }
 0x3d9   : > { %s1551_s16 = smov %s1553_s20  ;;  %15 = sbr.rel (!%p13_p10) target bundleno = 4 (0x4), region = 78 }
 0x3de   :  { %894 = vsyncpa [#allocation5], 1 }
 0x3df   :  { %896 = vsyncpa [#allocation5 + $0x1], 1 }

</bundles_post_ra>
